<compile_context>
chip_gen: v7x
topology: tpu7x:2x2x1
jax: 0.10.0
libtpu: 0.0.40
codegen_flags: <defaults>
</compile_context>

<pallas_src>
import functools

import jax
import jax.numpy as jnp
from jax.experimental import pallas as pl
from jax.experimental.pallas import tpu as pltpu

INPUT_SIZE = 10
HIDDEN_SIZE = 20
OUTPUT_SIZE = 1


def mlp_kernel(x_ref, w1_ref, b1_ref, w2_ref, b2_ref, o_ref):
    # x_ref:  (INPUT_SIZE, TB)            -- batch on the lane axis
    # w1_ref: (HIDDEN_SIZE, INPUT_SIZE)    b1_ref: (HIDDEN_SIZE, 1)
    # w2_ref: (OUTPUT_SIZE, HIDDEN_SIZE)   b2_ref: (1,) scalar in SMEM
    # o_ref:  (OUTPUT_SIZE, TB)
    x = x_ref[...]

    # Hidden layer: W1 @ x + b1 (lane-dense over batch), then ReLU on the VPU.
    h = jnp.dot(w1_ref[...], x, preferred_element_type=jnp.float32) + b1_ref[...]
    h = jnp.maximum(h, 0.0)

    # Output layer: W2 @ h + b2 (scalar bias read from SMEM).
    o_ref[...] = (
        jnp.dot(w2_ref[...], h, preferred_element_type=jnp.float32) + b2_ref[0]
    ).astype(o_ref.dtype)


@functools.partial(jax.jit, static_argnames=("tb",))
def multilayer_forward(x, w1, b1, w2, b2, *, tb=4096):
    """Forward pass matching PyTorch MultiLayer.

    x:  (B, INPUT_SIZE) float32
    w1: (HIDDEN_SIZE, INPUT_SIZE)   b1: (HIDDEN_SIZE,)   (native PyTorch layouts)
    w2: (OUTPUT_SIZE, HIDDEN_SIZE)  b2: (OUTPUT_SIZE,)
    returns (B, OUTPUT_SIZE) float32.
    """
    B = x.shape[0]

    # Batch tile: multiple of 128 lanes, no larger than the (padded) batch.
    # TODO(synk): tune tb per generation (v7x: 64 MiB VMEM; v5e/v6e: 128 MiB).
    tb = min(tb, pl.cdiv(B, 128) * 128)
    tb = pl.cdiv(tb, 128) * 128
    bp = pl.cdiv(B, tb) * tb

    # Feature-major: put the batch on the lane axis; pad batch to the tile.
    x_t = jnp.transpose(x)                       # (INPUT_SIZE, B)
    if bp != B:
        x_t = jnp.pad(x_t, ((0, 0), (0, bp - B)))

    b1c = b1.reshape(HIDDEN_SIZE, 1)             # column -> lane-broadcast
    b2s = b2.reshape(OUTPUT_SIZE)                # (1,) scalar -> SMEM

    out_t = pl.pallas_call(
        mlp_kernel,
        out_shape=jax.ShapeDtypeStruct((OUTPUT_SIZE, bp), jnp.float32),
        grid=(bp // tb,),
        in_specs=[
            pl.BlockSpec((INPUT_SIZE, tb), lambda i: (0, i)),           # x tile
            pl.BlockSpec((HIDDEN_SIZE, INPUT_SIZE), lambda i: (0, 0)),  # W1 (resident)
            pl.BlockSpec((HIDDEN_SIZE, 1), lambda i: (0, 0)),           # b1 (resident)
            pl.BlockSpec((OUTPUT_SIZE, HIDDEN_SIZE), lambda i: (0, 0)), # W2 (resident)
            pl.BlockSpec(memory_space=pltpu.MemorySpace.SMEM),          # b2 scalar
        ],
        out_specs=pl.BlockSpec((OUTPUT_SIZE, tb), lambda i: (0, i)),
        compiler_params=pltpu.CompilerParams(
            dimension_semantics=("parallel",),
        ),
    )(x_t, w1, b1c, w2, b2s)

    # Back to PyTorch's (B, OUTPUT_SIZE); (1, B) -> (B, 1) is layout-trivial.
    return jnp.transpose(out_t[:, :B])


if __name__ == "__main__":
    key = jax.random.PRNGKey(0)
    k_x, k_w1, k_b1, k_w2, k_b2, k_x2 = jax.random.split(key, 6)

    # Deterministic PyTorch-style init: U(-1/sqrt(fan_in), 1/sqrt(fan_in))
    bound1 = 1.0 / (INPUT_SIZE ** 0.5)
    w1 = jax.random.uniform(k_w1, (HIDDEN_SIZE, INPUT_SIZE),
                            minval=-bound1, maxval=bound1, dtype=jnp.float32)
    b1 = jax.random.uniform(k_b1, (HIDDEN_SIZE,),
                            minval=-bound1, maxval=bound1, dtype=jnp.float32)

    bound2 = 1.0 / (HIDDEN_SIZE ** 0.5)
    w2 = jax.random.uniform(k_w2, (OUTPUT_SIZE, HIDDEN_SIZE),
                            minval=-bound2, maxval=bound2, dtype=jnp.float32)
    b2 = jax.random.uniform(k_b2, (OUTPUT_SIZE,),
                            minval=-bound2, maxval=bound2, dtype=jnp.float32)

    def ref_fwd(xr):
        return jnp.maximum(xr @ w1.T + b1, 0.0) @ w2.T + b2

    # Small-batch check (single grid step, padded lanes sliced off).
    B = 8
    x = jax.random.normal(k_x, (B, INPUT_SIZE), dtype=jnp.float32)
    out = jax.block_until_ready(multilayer_forward(x, w1, b1, w2, b2))
    assert out.shape == (B, OUTPUT_SIZE)
    assert jnp.allclose(out, ref_fwd(x), atol=1e-5, rtol=1e-5)

    # Multi-step parallel grid check (B not a multiple of the tile).
    B2 = 300
    x2 = jax.random.normal(k_x2, (B2, INPUT_SIZE), dtype=jnp.float32)
    out2 = jax.block_until_ready(multilayer_forward(x2, w1, b1, w2, b2, tb=128))
    assert out2.shape == (B2, OUTPUT_SIZE)
    assert jnp.allclose(out2, ref_fwd(x2), atol=1e-5, rtol=1e-5)

    print("KERNEL_OK")
</pallas_src>

<mosaic_0001>
module attributes {stable_mosaic.version = 11 : i64} {
  func.func @mlp_kernel(%arg0: i32, %arg1: memref<10x128xf32, #tpu.memory_space<vmem>>, %arg2: memref<20x10xf32, #tpu.memory_space<vmem>>, %arg3: memref<20x1xf32, #tpu.memory_space<vmem>>, %arg4: memref<1x20xf32, #tpu.memory_space<vmem>>, %arg5: memref<1xf32, #tpu.memory_space<smem>>, %arg6: memref<1x128xf32, #tpu.memory_space<vmem>>) attributes {dimension_semantics = [#tpu.dimension_semantics<parallel>], iteration_bounds = array<i64: 1>, scalar_prefetch = 0 : i64, scratch_operands = 0 : i64, tpu.core_type = #tpu.core_type<tc>, window_params = [{transform_indices = @transform_0, window_bounds = array<i64: 10, 128>}, {pipeline_mode = #tpu.pipeline_mode<synchronous>, transform_indices = @transform_1, window_bounds = array<i64: 20, 10>}, {pipeline_mode = #tpu.pipeline_mode<synchronous>, transform_indices = @transform_2, window_bounds = array<i64: 20, 1>}, {pipeline_mode = #tpu.pipeline_mode<synchronous>, transform_indices = @transform_3, window_bounds = array<i64: 1, 20>}, {transform_indices = @transform_4, window_bounds = array<i64: 1>}, {transform_indices = @transform_5, window_bounds = array<i64: 1, 128>}]} {
    %c0 = arith.constant 0 : index
    %c0_0 = arith.constant 0 : index
    %0 = vector.load %arg1[%c0, %c0_0] : memref<10x128xf32, #tpu.memory_space<vmem>>, vector<10x128xf32>
    %c0_1 = arith.constant 0 : index
    %c0_2 = arith.constant 0 : index
    %1 = vector.load %arg2[%c0_1, %c0_2] : memref<20x10xf32, #tpu.memory_space<vmem>>, vector<20x10xf32>
    %cst = arith.constant dense<0.000000e+00> : vector<20x128xf32>
    %2 = tpu.matmul %1, %0, %cst {dimension_numbers = #tpu.dot_dimension_numbers<[1], [0], [0], [1], [0, 0, 1, 1], [], []>} : vector<20x10xf32>, vector<10x128xf32>, vector<20x128xf32> -> vector<20x128xf32>
    %c0_3 = arith.constant 0 : index
    %c0_4 = arith.constant 0 : index
    %3 = vector.load %arg3[%c0_3, %c0_4] : memref<20x1xf32, #tpu.memory_space<vmem>>, vector<20x1xf32>
    %4 = vector.broadcast %3 : vector<20x1xf32> to vector<20x128xf32>
    %5 = arith.addf %2, %4 : vector<20x128xf32>
    %cst_5 = arith.constant 0.000000e+00 : f32
    %6 = vector.broadcast %cst_5 : f32 to vector<20x128xf32>
    %7 = arith.maximumf %5, %6 : vector<20x128xf32>
    %c0_6 = arith.constant 0 : index
    %c0_7 = arith.constant 0 : index
    %8 = vector.load %arg4[%c0_6, %c0_7] : memref<1x20xf32, #tpu.memory_space<vmem>>, vector<1x20xf32>
    %cst_8 = arith.constant dense<0.000000e+00> : vector<1x128xf32>
    %9 = tpu.matmul %8, %7, %cst_8 {dimension_numbers = #tpu.dot_dimension_numbers<[1], [0], [0], [1], [0, 0, 1, 1], [], []>} : vector<1x20xf32>, vector<20x128xf32>, vector<1x128xf32> -> vector<1x128xf32>
    %c0_9 = arith.constant 0 : index
    %10 = memref.load %arg5[%c0_9] : memref<1xf32, #tpu.memory_space<smem>>
    %11 = vector.broadcast %10 : f32 to vector<1x128xf32>
    %12 = arith.addf %9, %11 : vector<1x128xf32>
    %c0_10 = arith.constant 0 : index
    %c0_11 = arith.constant 0 : index
    %13 = vector.load %arg6[%c0_10, %c0_11] : memref<1x128xf32, #tpu.memory_space<vmem>>, vector<1x128xf32>
    tpu.vector_store %arg6[%c0_10, %c0_11], %12 {strides = array<i32>} : memref<1x128xf32, #tpu.memory_space<vmem>>, vector<1x128xf32>,
    return
  }
  func.func @transform_0(%arg0: i32) -> (i32, i32) {
    %c0_i32 = arith.constant 0 : i32
    %c0_i32_0 = arith.constant 0 : i32
    return %c0_i32, %arg0 : i32, i32
  }
  func.func @transform_1(%arg0: i32) -> (i32, i32) {
    %c0_i32 = arith.constant 0 : i32
    %c0_i32_0 = arith.constant 0 : i32
    %c0_i32_1 = arith.constant 0 : i32
    return %c0_i32, %c0_i32_0 : i32, i32
  }
  func.func @transform_2(%arg0: i32) -> (i32, i32) {
    %c0_i32 = arith.constant 0 : i32
    %c0_i32_0 = arith.constant 0 : i32
    %c0_i32_1 = arith.constant 0 : i32
    return %c0_i32, %c0_i32_0 : i32, i32
  }
  func.func @transform_3(%arg0: i32) -> (i32, i32) {
    %c0_i32 = arith.constant 0 : i32
    %c0_i32_0 = arith.constant 0 : i32
    %c0_i32_1 = arith.constant 0 : i32
    return %c0_i32, %c0_i32_0 : i32, i32
  }
  func.func @transform_4(%arg0: i32) -> i32 {
    %c0_i32 = arith.constant 0 : i32
    %c0_i32_0 = arith.constant 0 : i32
    return %c0_i32 : i32
  }
  func.func @transform_5(%arg0: i32) -> (i32, i32) {
    %c0_i32 = arith.constant 0 : i32
    %c0_i32_0 = arith.constant 0 : i32
    return %c0_i32, %arg0 : i32, i32
  }
}

</mosaic_0001>

<bundles_post_ra>
// kernel: multilayer_forward.1
= control target key start
LH: loop header
LB: loop body
LE: loop exit
PB: predicated region body
PF: predicated region fallthrough
CT: control target
= control target key end

     0   :  { %vm54_vm0 = vcmask 1041408   ;;  %v278_v0 = vmov 0.0|0.0   ;;  %vm279_vm1 = vmmov 1   ;;  %vm280_vm3 = vmmov 0   ;;  %s350_s0 = inlined_call_operand.vmem [shape: f32[10,128], index: 0, kind: input, shape index: {}]   ;;  %s351_s2 = inlined_call_operand.vmem [shape: f32[20,1], index: 2, kind: input, shape index: {}]   ;;  %s352_s1 = inlined_call_operand.vmem [shape: f32[20,10], index: 1, kind: input, shape index: {}]   ;;  %s353_s3 = inlined_call_operand.vmem [shape: f32[1,20], index: 3, kind: input, shape index: {}]   ;;  %s354_s4 = inlined_call_operand.<no memory space> [shape: f32[1], index: 4, kind: input, shape index: {}]   ;;  %s355_s5 = inlined_call_operand.vmem [shape: f32[1,128], index: 5, kind: output, shape index: {}]  }
   0x1   :  { %264 = vmatprep.subr.bf16.mxu0 %v278_v0  ;;  %v21_v1 = vld [vmem:[%s350_s0] sm:$0xff]  ;;  %v22_v2 = vld [vmem:[%s350_s0 + $0x8] sm:$0x3]  ;;  %vm266_vm2 = vmpackc.low %vm54_vm0, %vm279_vm1  ;;  %268 = vmatprep.subr.bf16.mxu1 %v278_v0  ;;  %v281_v4 = vmov 0.0   ;;  %v282_v5 = vmov 0   ;;  %vm44_vm4 = vcmask 80896   ;;  %v143_v29 = vstv %s354_s4 }
   0x2   :  { %v265_v3 = vpack.c.bf16 %v22_v2, %v21_v1  ;;  %246 = vmatprep.mubr.msk.f32.mxu0 %vm280_vm3, %v281_v4  ;;  %276 = vset.pattern.permute.xlu0 %v282_v5  ;;  %v26_v6 = vld [vmem:[%s351_s2] sm:$0xff]  ;;  %v28_v7 = vld [vmem:[%s351_s2 + $0x10] sm:$0xf]  ;;  %v27_v9 = vld [vmem:[%s351_s2 + $0x8] sm:$0xff]  ;;  %vm148_vm5 = vcmask 1043456   ;;  %vm144_vm6 = vcmask 162816  }
   0x3   :  { %277 = vset.pattern.permute.xlu1 %v282_v5  ;;  %261 = vmatprep.mubr.msk.f32.mxu1 %vm280_vm3, %v281_v4  ;;  %v23_v8 = vld [vmem:[%s352_s1] sm:$0xff]  ;;  %v24_v10 = vld [vmem:[%s352_s1 + $0x8] sm:$0xff]  ;;  %v25_v11 = vld [vmem:[%s352_s1 + $0x10] sm:$0xf] }
   0x4   :  { %267 = vmatpush3.bf16.msk.msra.mxu0 %vm266_vm2, %v265_v3  ;;  %31 = vperm.xlu0 %276, %v26_v6   ;;  %v141_v28 = vld [vmem:[%s353_s3] sm:$0x1] }
   0x5   :  { %41 = vperm.xlu1 %277, %v28_v7  }
   0x7   :  { %247 = vmatmul.mubr.msk.f32.vlgmr.msra.gmra.mrb[0].mxu0 %vm44_vm4, %v23_v8 }
   0x8   :  { %249 = vmatprep.mubr.msk.f32.mxu0 %vm280_vm3, %v281_v4  ;;  %36 = vperm.xlu0 %276, %v27_v9  }
   0xb   :  { %250 = vmatmul.mubr.msk.f32.gmra.mrb[2].mxu0 %vm44_vm4, %v24_v10 }
   0xc   :  { %252 = vmatprep.mubr.msk.f32.mxu0 %vm280_vm3, %v281_v4 }
   0xf   :  { %253 = vmatmul.mubr.msk.f32.gmra.mrb[4].mxu0 %vm44_vm4, %v25_v11 }
  0x83   :  { %v32_v12 = vpop.permute.xlu0 %31 }
  0x84   :  { %v42_v20 = vpop.permute.xlu1 %41 }
  0x87   :  { %v37_v16 = vpop.permute.xlu0 %36 }
  0xda   :  { %v124_v13 = vpop.f32.mrb[0].mxu0 }
  0xdb   :  { %v248_v14 = vpop.f32.mrb[1].mxu0  ;;  %v125_v15 = vadd.f32 %v124_v13, %v32_v12 }
  0xdd   :  { %v138_v21 = vmax.f32 %v125_v15, 0.0 }
  0xde   :  { %v129_v17 = vpop.f32.mrb[2].mxu0 }
  0xdf   :  { %v130_v18 = vadd.f32 %v129_v17, %v37_v16  ;;  %v251_v19 = vpop.f32.mrb[3].mxu0 }
  0xe1   :  { %v139_v22 = vmax.f32 %v130_v18, 0.0 }
  0xe2   :  { %v134_v23 = vpop.f32.mrb[4].mxu0 }
  0xe3   :  { %v135_v24 = vadd.f32 %v134_v23, %v42_v20  ;;  %v254_v25 = vpop.f32.mrb[5].mxu0  ;;  %v269_v26 = vpack.c.bf16 %v139_v22, %v138_v21 }
  0xe5   :  { %v140_v27 = vmax.f32 %v135_v24, 0.0  ;;  %270 = vmatpush3.bf16.msra.mxu1 %v269_v26 }
  0xe6   :  { %259 = vmatprep.subr.mxu1 %v281_v4 }
  0xe9   :  { %260 = vmatpush3.msk.msra.mxu1 %vm148_vm5, %v140_v27 }
  0xea   :  { %262 = vmatmul.mubr.msk.f32.vlgmr.msra.gmra.mrb[0].mxu1 %vm144_vm6, %v141_v28 }
 0x1bd   :  { %v218_v30 = vpop.f32.mrb[0].mxu1 }
 0x1be   :  { %v219_v31 = vadd.f32 %v218_v30, %v143_v29  ;;  %v263_v32 = vpop.f32.mrb[1].mxu1 }
 0x1c0   :  { %222 = vst [vmem:[%s355_s5] sm:$0x1] %v219_v31 }

</bundles_post_ra>
